<compile_context>
chip_gen: v7x
topology: tpu7x:2x2x1
jax: 0.10.0
libtpu: 0.0.40
codegen_flags: <defaults>
</compile_context>

<pallas_src>
import jax
import jax.numpy as jnp
from jax.experimental import pallas as pl
from jax.experimental.pallas import tpu as pltpu


def conv_relu_pool_kernel(taps_ref, w_ref, b_ref, o_ref):
    # taps_ref : (4, tn, tl)  deinterleaved padded input at the pooled rate:
    #            taps[k][n, p] = x_pad[n, 2*p + k]
    # w_ref    : (C, 3)       conv weight (channels on sublanes, taps on lanes)
    # b_ref    : (C, 1)       conv bias
    # o_ref    : (tn, C, tl)  NCL output tile (pooled positions on lanes)
    w0 = w_ref[:, 0:1]            # (C, 1) -> lane-broadcast per channel row
    w1 = w_ref[:, 1:2]
    w2 = w_ref[:, 2:3]
    bias = b_ref[...]             # (C, 1)

    xa = taps_ref[0, :, :][:, None, :]   # (tn, 1, tl) -> sublane-broadcast over C
    xb = taps_ref[1, :, :][:, None, :]
    xc = taps_ref[2, :, :][:, None, :]
    xd = taps_ref[3, :, :][:, None, :]

    # Conv1d(k=3, p=1) at the even / odd position of every pooled pair, as VPU
    # broadcast MACs.  Layout: (batch, C on sublanes, pooled position on lanes).
    y_even = xa * w0 + xb * w1 + xc * w2     # (tn, C, tl)
    y_odd = xb * w0 + xc * w1 + xd * w2      # (tn, C, tl)

    # max(relu(e + b), relu(o + b)) == relu(max(e, o) + b): bias + ReLU hoisted out.
    o_ref[...] = jnp.maximum(jnp.maximum(y_even, y_odd) + bias, 0.0)


def _pick_tiles(n, l_out):
    # Batch tile: second-to-last dim of the taps block must be a multiple of 8 or
    # equal the full batch extent.
    tn = 8 if (n > 8 and n % 8 == 0) else n
    # Pooled-length (lane) tile: a multiple of 128 when possible, else full extent.
    tl = l_out
    if l_out % 128 == 0:
        for cand in (512, 256, 128):
            if l_out % cand == 0:
                tl = cand
                break
    return tn, tl


def cnn_model1_forward(x, weight, bias):
    """x: (N, 1, L), weight: (C, 1, 3), bias: (C,)  ->  (N, C, L // 2) float32."""
    n, c_in, length = x.shape
    assert c_in == 1
    c = weight.shape[0]
    l_out = length // 2

    # Small-tensor prep in XLA (input is ~1/50th of the output HBM traffic):
    # pad for k=3/p=1, then deinterleave into the 4 taps each pooled pair needs.
    x_pad = jnp.pad(x[:, 0, :], ((0, 0), (1, 1)))                       # (N, L+2)
    taps = jnp.stack(
        [x_pad[:, k:k + 2 * l_out:2] for k in range(4)], axis=0)        # (4, N, L/2)
    w_c3 = weight[:, 0, :]                                              # (C, 3)
    b_c1 = bias.reshape(c, 1)                                           # (C, 1)

    tn, tl = _pick_tiles(n, l_out)
    grid = (n // tn, l_out // tl)

    flops = 12 * n * l_out * c                      # 6 MACs per pooled output element
    bytes_accessed = 4 * (4 * n * l_out + 4 * c + n * c * l_out)

    return pl.pallas_call(
        conv_relu_pool_kernel,
        out_shape=jax.ShapeDtypeStruct((n, c, l_out), jnp.float32),
        grid=grid,
        in_specs=[
            pl.BlockSpec((4, tn, tl), lambda i, j: (0, i, j)),
            pl.BlockSpec((c, 3), lambda i, j: (0, 0)),
            pl.BlockSpec((c, 1), lambda i, j: (0, 0)),
        ],
        out_specs=pl.BlockSpec((tn, c, tl), lambda i, j: (i, 0, j)),
        compiler_params=pltpu.CompilerParams(
            dimension_semantics=("parallel", "parallel"),
            vmem_limit_bytes=32 * 1024 * 1024,
        ),
        cost_estimate=pl.CostEstimate(
            flops=flops, transcendentals=0, bytes_accessed=bytes_accessed),
    )(taps, w_c3, b_c1)


if __name__ == "__main__":
    key = jax.random.PRNGKey(0)
    k_x, k_w, k_b = jax.random.split(key, 3)

    N, L, C_OUT, K = 2, 16, 100, 3

    # Deterministic synthetic parameters (shapes from nn.Conv1d(1, 100, 3, padding=1)).
    x = jax.random.normal(k_x, (N, 1, L), dtype=jnp.float32)
    weight = jax.random.normal(k_w, (C_OUT, 1, K), dtype=jnp.float32) * 0.5
    bias = jax.random.normal(k_b, (C_OUT,), dtype=jnp.float32) * 0.1

    out = jax.jit(cnn_model1_forward)(x, weight, bias)
    out = jax.block_until_ready(out)
    assert out.shape == (N, C_OUT, L // 2), out.shape

    # Plain-JAX reference (same math as PyTorch CNNModel1.forward).
    xp = jnp.pad(x[:, 0, :], ((0, 0), (1, 1)))
    cols = jnp.stack([xp[:, 0:L], xp[:, 1:L + 1], xp[:, 2:L + 2]], axis=-1)
    ref = jnp.einsum("nlk,ck->ncl", cols, weight[:, 0, :]) + bias[None, :, None]
    ref = jnp.maximum(ref, 0.0)
    ref = jnp.max(ref.reshape(N, C_OUT, L // 2, 2), axis=-1)
    assert jnp.allclose(out, ref, atol=1e-5, rtol=1e-5)

    print("KERNEL_OK")
</pallas_src>

<mosaic_0001>
module attributes {stable_mosaic.version = 11 : i64} {
  func.func @conv_relu_pool_kernel(%arg0: i32, %arg1: i32, %arg2: memref<4x2x8xf32, #tpu.memory_space<vmem>>, %arg3: memref<100x3xf32, #tpu.memory_space<vmem>>, %arg4: memref<100x1xf32, #tpu.memory_space<vmem>>, %arg5: memref<2x100x8xf32, #tpu.memory_space<vmem>>) attributes {dimension_semantics = [#tpu.dimension_semantics<parallel>, #tpu.dimension_semantics<parallel>], iteration_bounds = array<i64: 1, 1>, scalar_prefetch = 0 : i64, scratch_operands = 0 : i64, tpu.core_type = #tpu.core_type<tc>, window_params = [{transform_indices = @transform_0, window_bounds = array<i64: 4, 2, 8>}, {pipeline_mode = #tpu.pipeline_mode<synchronous>, transform_indices = @transform_1, window_bounds = array<i64: 100, 3>}, {pipeline_mode = #tpu.pipeline_mode<synchronous>, transform_indices = @transform_2, window_bounds = array<i64: 100, 1>}, {transform_indices = @transform_3, window_bounds = array<i64: 2, 100, 8>}]} {
    %c0 = arith.constant 0 : index
    %c0_0 = arith.constant 0 : index
    %0 = vector.load %arg3[%c0, %c0_0] : memref<100x3xf32, #tpu.memory_space<vmem>>, vector<100x1xf32>
    %c0_1 = arith.constant 0 : index
    %c1 = arith.constant 1 : index
    %1 = vector.load %arg3[%c0_1, %c1] : memref<100x3xf32, #tpu.memory_space<vmem>>, vector<100x1xf32>
    %c0_2 = arith.constant 0 : index
    %c2 = arith.constant 2 : index
    %2 = vector.load %arg3[%c0_2, %c2] : memref<100x3xf32, #tpu.memory_space<vmem>>, vector<100x1xf32>
    %c0_3 = arith.constant 0 : index
    %c0_4 = arith.constant 0 : index
    %3 = vector.load %arg4[%c0_3, %c0_4] : memref<100x1xf32, #tpu.memory_space<vmem>>, vector<100x1xf32>
    %c0_5 = arith.constant 0 : index
    %c0_6 = arith.constant 0 : index
    %c0_7 = arith.constant 0 : index
    %4 = vector.load %arg2[%c0_5, %c0_6, %c0_7] : memref<4x2x8xf32, #tpu.memory_space<vmem>>, vector<1x2x8xf32>
    %5 = vector.shape_cast %4 : vector<1x2x8xf32> to vector<2x8xf32>
    %6 = vector.shape_cast %5 : vector<2x8xf32> to vector<2x1x8xf32>
    %c1_8 = arith.constant 1 : index
    %c0_9 = arith.constant 0 : index
    %c0_10 = arith.constant 0 : index
    %7 = vector.load %arg2[%c1_8, %c0_9, %c0_10] : memref<4x2x8xf32, #tpu.memory_space<vmem>>, vector<1x2x8xf32>
    %8 = vector.shape_cast %7 : vector<1x2x8xf32> to vector<2x8xf32>
    %9 = vector.shape_cast %8 : vector<2x8xf32> to vector<2x1x8xf32>
    %c2_11 = arith.constant 2 : index
    %c0_12 = arith.constant 0 : index
    %c0_13 = arith.constant 0 : index
    %10 = vector.load %arg2[%c2_11, %c0_12, %c0_13] : memref<4x2x8xf32, #tpu.memory_space<vmem>>, vector<1x2x8xf32>
    %11 = vector.shape_cast %10 : vector<1x2x8xf32> to vector<2x8xf32>
    %12 = vector.shape_cast %11 : vector<2x8xf32> to vector<2x1x8xf32>
    %c3 = arith.constant 3 : index
    %c0_14 = arith.constant 0 : index
    %c0_15 = arith.constant 0 : index
    %13 = vector.load %arg2[%c3, %c0_14, %c0_15] : memref<4x2x8xf32, #tpu.memory_space<vmem>>, vector<1x2x8xf32>
    %14 = vector.shape_cast %13 : vector<1x2x8xf32> to vector<2x8xf32>
    %15 = vector.shape_cast %14 : vector<2x8xf32> to vector<2x1x8xf32>
    %16 = vector.shape_cast %0 : vector<100x1xf32> to vector<1x100x1xf32>
    %17 = vector.broadcast %6 : vector<2x1x8xf32> to vector<2x100x8xf32>
    %18 = vector.broadcast %16 : vector<1x100x1xf32> to vector<2x100x8xf32>
    %19 = arith.mulf %17, %18 : vector<2x100x8xf32>
    %20 = vector.shape_cast %1 : vector<100x1xf32> to vector<1x100x1xf32>
    %21 = vector.broadcast %9 : vector<2x1x8xf32> to vector<2x100x8xf32>
    %22 = vector.broadcast %20 : vector<1x100x1xf32> to vector<2x100x8xf32>
    %23 = arith.mulf %21, %22 : vector<2x100x8xf32>
    %24 = arith.addf %19, %23 : vector<2x100x8xf32>
    %25 = vector.shape_cast %2 : vector<100x1xf32> to vector<1x100x1xf32>
    %26 = vector.broadcast %12 : vector<2x1x8xf32> to vector<2x100x8xf32>
    %27 = vector.broadcast %25 : vector<1x100x1xf32> to vector<2x100x8xf32>
    %28 = arith.mulf %26, %27 : vector<2x100x8xf32>
    %29 = arith.addf %24, %28 : vector<2x100x8xf32>
    %30 = vector.shape_cast %0 : vector<100x1xf32> to vector<1x100x1xf32>
    %31 = vector.broadcast %9 : vector<2x1x8xf32> to vector<2x100x8xf32>
    %32 = vector.broadcast %30 : vector<1x100x1xf32> to vector<2x100x8xf32>
    %33 = arith.mulf %31, %32 : vector<2x100x8xf32>
    %34 = vector.shape_cast %1 : vector<100x1xf32> to vector<1x100x1xf32>
    %35 = vector.broadcast %12 : vector<2x1x8xf32> to vector<2x100x8xf32>
    %36 = vector.broadcast %34 : vector<1x100x1xf32> to vector<2x100x8xf32>
    %37 = arith.mulf %35, %36 : vector<2x100x8xf32>
    %38 = arith.addf %33, %37 : vector<2x100x8xf32>
    %39 = vector.shape_cast %2 : vector<100x1xf32> to vector<1x100x1xf32>
    %40 = vector.broadcast %15 : vector<2x1x8xf32> to vector<2x100x8xf32>
    %41 = vector.broadcast %39 : vector<1x100x1xf32> to vector<2x100x8xf32>
    %42 = arith.mulf %40, %41 : vector<2x100x8xf32>
    %43 = arith.addf %38, %42 : vector<2x100x8xf32>
    %44 = arith.maximumf %29, %43 : vector<2x100x8xf32>
    %45 = vector.shape_cast %3 : vector<100x1xf32> to vector<1x100x1xf32>
    %46 = vector.broadcast %45 : vector<1x100x1xf32> to vector<2x100x8xf32>
    %47 = arith.addf %44, %46 : vector<2x100x8xf32>
    %cst = arith.constant 0.000000e+00 : f32
    %48 = vector.broadcast %cst : f32 to vector<2x100x8xf32>
    %49 = arith.maximumf %47, %48 : vector<2x100x8xf32>
    %c0_16 = arith.constant 0 : index
    %c0_17 = arith.constant 0 : index
    %c0_18 = arith.constant 0 : index
    %50 = vector.load %arg5[%c0_16, %c0_17, %c0_18] : memref<2x100x8xf32, #tpu.memory_space<vmem>>, vector<2x100x8xf32>
    tpu.vector_store %arg5[%c0_16, %c0_17, %c0_18], %49 {strides = array<i32>} : memref<2x100x8xf32, #tpu.memory_space<vmem>>, vector<2x100x8xf32>,
    return
  }
  func.func @transform_0(%arg0: i32, %arg1: i32) -> (i32, i32, i32) {
    %c0_i32 = arith.constant 0 : i32
    %c0_i32_0 = arith.constant 0 : i32
    return %c0_i32, %arg0, %arg1 : i32, i32, i32
  }
  func.func @transform_1(%arg0: i32, %arg1: i32) -> (i32, i32) {
    %c0_i32 = arith.constant 0 : i32
    %c0_i32_0 = arith.constant 0 : i32
    %c0_i32_1 = arith.constant 0 : i32
    return %c0_i32, %c0_i32_0 : i32, i32
  }
  func.func @transform_2(%arg0: i32, %arg1: i32) -> (i32, i32) {
    %c0_i32 = arith.constant 0 : i32
    %c0_i32_0 = arith.constant 0 : i32
    %c0_i32_1 = arith.constant 0 : i32
    return %c0_i32, %c0_i32_0 : i32, i32
  }
  func.func @transform_3(%arg0: i32, %arg1: i32) -> (i32, i32, i32) {
    %c0_i32 = arith.constant 0 : i32
    %c0_i32_0 = arith.constant 0 : i32
    return %arg0, %c0_i32, %arg1 : i32, i32, i32
  }
}

</mosaic_0001>

<bundles_post_ra>
// kernel: cnn_model1_forward.1
= control target key start
LH: loop header
LB: loop body
LE: loop exit
PB: predicated region body
PF: predicated region fallthrough
CT: control target
= control target key end

     0   :  { %v801_v0 = vmov 1   ;;  %v802_v1 = vmov 0   ;;  %v803_v15 = vmov 2   ;;  %v804_v31 = vmov 1966171168   ;;  %s1662_s1 = inlined_call_operand.vmem [shape: f32[100,3], index: 1, kind: input, shape index: {}]   ;;  %s1663_s2 = inlined_call_operand.vmem [shape: f32[100,1], index: 2, kind: input, shape index: {}]   ;;  %s1664_s0 = inlined_call_operand.vmem [shape: f32[4,2,8], index: 0, kind: input, shape index: {}]   ;;  %s1665_s3 = inlined_call_operand.vmem [shape: f32[2,100,8], index: 3, kind: output, shape index: {}]  }
   0x1   :  { %796 = vset.pattern.permute.xlu0 %v801_v0  ;;  %794 = vset.pattern.permute.xlu1 %v802_v1  ;;  %v16_v2 = vld [vmem:[%s1662_s1 + $0x10] sm:$0xff]  ;;  %v15_v3 = vld [vmem:[%s1662_s1 + $0x8] sm:$0xff]  ;;  %v17_v4 = vld [vmem:[%s1662_s1 + $0x18] sm:$0xff]  ;;  %v51_v32 = vunpack.c.l.s4 %v804_v31  ;;  %v53_v33 = vlaneseq  ;;  %vm751_vm0 = vcmask 64512   ;;  %vm764_vm1 = vcmask 60416  }
   0x2   :  { %161 = vperm.xlu1 %794, %v16_v2   ;;  %255 = vperm.xlu0 %796, %v15_v3   ;;  %v18_v5 = vld [vmem:[%s1662_s1 + $0x20] sm:$0xff]  ;;  %v19_v6 = vld [vmem:[%s1662_s1 + $0x28] sm:$0xff]  ;;  %v20_v7 = vld [vmem:[%s1662_s1 + $0x30] sm:$0xff] }
   0x3   :  { %v21_v8 = vld [vmem:[%s1662_s1 + $0x38] sm:$0xff]  ;;  %v22_v9 = vld [vmem:[%s1662_s1 + $0x40] sm:$0xff]  ;;  %v23_v10 = vld [vmem:[%s1662_s1 + $0x48] sm:$0xff]  ;;  %v52_v36 = vunpack.c.0.s8 %v51_v32  ;;  %v54_v37 = vshrl.u32 %v53_v33, 7 }
   0x4   :  { %v24_v11 = vld [vmem:[%s1662_s1 + $0x50] sm:$0xff]  ;;  %v25_v12 = vld [vmem:[%s1662_s1 + $0x58] sm:$0xff]  ;;  %v26_v13 = vld [vmem:[%s1662_s1 + $0x60] sm:$0xf] }
   0x5   :  { %v14_v14 = vld [vmem:[%s1662_s1] sm:$0xff]  ;;  %v28_v16 = vld [vmem:[%s1663_s2 + $0x8] sm:$0xff]  ;;  %v33_v19 = vld [vmem:[%s1663_s2 + $0x30] sm:$0xff]  ;;  %v55_v43 = vsub.s32 %v52_v36, %v54_v37  ;;  %v141_v50 = vsub.s32 0, %v54_v37 }
   0x6   :  { %166 = vperm.xlu1 %794, %v17_v4   ;;  %267 = vperm.xlu0 %796, %v18_v5   ;;  %v31_v17 = vld [vmem:[%s1663_s2 + $0x20] sm:$0xff]  ;;  %v29_v20 = vld [vmem:[%s1663_s2 + $0x10] sm:$0xff]  ;;  %v30_v22 = vld [vmem:[%s1663_s2 + $0x18] sm:$0xff] }
   0x7   :  { %v27_v18 = vld [vmem:[%s1663_s2] sm:$0xff]  ;;  %v37_v23 = vld [vmem:[%s1663_s2 + $0x50] sm:$0xff]  ;;  %v32_v24 = vld [vmem:[%s1663_s2 + $0x28] sm:$0xff] }
   0x8   :  { %v35_v21 = vld [vmem:[%s1663_s2 + $0x40] sm:$0xff]  ;;  %v34_v26 = vld [vmem:[%s1663_s2 + $0x38] sm:$0xff]  ;;  %v36_v27 = vld [vmem:[%s1663_s2 + $0x48] sm:$0xff] }
   0x9   :  { %v39_v25 = vld [vmem:[%s1663_s2 + $0x60] sm:$0xf]  ;;  %v38_v28 = vld [vmem:[%s1663_s2 + $0x58] sm:$0xff] }
   0xa   :  { %176 = vperm.xlu1 %794, %v19_v6   ;;  %275 = vperm.xlu0 %796, %v20_v7   ;;  %v783_v38 = vld.sshfl [vmem:[%s1664_s0] sm:$0x11 pattern:$0x75316420] }
   0xb   :  { %v785_v39 = vld.sshfl [vmem:[%s1664_s0 + $0x2] sm:$0x11 pattern:$0x75316420]  ;;  %v49_v44 = vcombine.high %v783_v38, %v783_v38  ;;  %v56_v52 = vrot.slane %v783_v38, %v55_v43 }
   0xc   :  { %v787_v40 = vld.sshfl [vmem:[%s1664_s0 + $0x4] sm:$0x11 pattern:$0x75316420]  ;;  %v74_v45 = vcombine.high %v785_v39, %v785_v39  ;;  %v81_v54 = vrot.slane %v785_v39, %v55_v43 }
   0xd   :  { %v789_v46 = vld.sshfl [vmem:[%s1664_s0 + $0x6] sm:$0x11 pattern:$0x75316420]  ;;  %v99_v47 = vcombine.high %v787_v40, %v787_v40  ;;  %v63_v53 = vrot.slane %v49_v44, %v55_v43  ;;  %v106_v56 = vrot.slane %v787_v40, %v55_v43  ;;  %v918_v62 = vrot.slane %v56_v52, %v141_v50 }
   0xe   :  { %186 = vperm.xlu1 %794, %v21_v8   ;;  %283 = vperm.xlu0 %796, %v22_v9   ;;  %v124_v51 = vcombine.high %v789_v46, %v789_v46  ;;  %v88_v55 = vrot.slane %v74_v45, %v55_v43  ;;  %v131_v60 = vrot.slane %v789_v46, %v55_v43 }
   0xf   :  { %v113_v57 = vrot.slane %v99_v47, %v55_v43  ;;  %v920_v63 = vrot.slane %v63_v53, %v141_v50 }
  0x10   :  { %v138_v61 = vrot.slane %v124_v51, %v55_v43 }
  0x12   :  { %196 = vperm.xlu1 %794, %v23_v10   ;;  %291 = vperm.xlu0 %796, %v24_v11  }
  0x16   :  { %206 = vperm.xlu1 %794, %v25_v12   ;;  %299 = vperm.xlu0 %796, %v26_v13  }
  0x1a   :  { %795 = vset.pattern.permute.xlu1 %v801_v0  ;;  %798 = vset.pattern.permute.xlu0 %v803_v15  ;;  %v922_v0 = vrot.slane %v81_v54, %v141_v50 }
  0x1b   :  { %369 = vperm.xlu0 %798, %v15_v3   ;;  %251 = vperm.xlu1 %795, %v14_v14  }
  0x1f   :  { %381 = vperm.xlu0 %798, %v18_v5   ;;  %259 = vperm.xlu1 %795, %v16_v2  }
  0x23   :  { %389 = vperm.xlu0 %798, %v20_v7   ;;  %263 = vperm.xlu1 %795, %v17_v4  }
  0x27   :  { %397 = vperm.xlu0 %798, %v22_v9   ;;  %271 = vperm.xlu1 %795, %v19_v6  }
  0x2b   :  { %405 = vperm.xlu0 %798, %v24_v11   ;;  %279 = vperm.xlu1 %795, %v21_v8  }
  0x2f   :  { %413 = vperm.xlu0 %798, %v26_v13   ;;  %287 = vperm.xlu1 %795, %v23_v10  }
  0x33   :  { %799 = vset.pattern.permute.xlu0 %v802_v1  ;;  %295 = vperm.xlu1 %795, %v25_v12  }
  0x34   :  { %151 = vperm.xlu0 %799, %v14_v14  }
  0x37   :  { %797 = vset.pattern.permute.xlu1 %v803_v15 }
  0x38   :  { %156 = vperm.xlu0 %799, %v15_v3   ;;  %365 = vperm.xlu1 %797, %v14_v14   ;;  %v928_v3 = vrot.slane %v113_v57, %v141_v50 }
  0x3c   :  { %171 = vperm.xlu0 %799, %v18_v5   ;;  %373 = vperm.xlu1 %797, %v16_v2   ;;  %v926_v2 = vrot.slane %v106_v56, %v141_v50 }
  0x40   :  { %181 = vperm.xlu0 %799, %v20_v7   ;;  %377 = vperm.xlu1 %797, %v17_v4   ;;  %v932_v7 = vrot.slane %v138_v61, %v141_v50 }
  0x44   :  { %191 = vperm.xlu0 %799, %v22_v9   ;;  %385 = vperm.xlu1 %797, %v19_v6   ;;  %v930_v6 = vrot.slane %v131_v60, %v141_v50 }
  0x48   :  { %201 = vperm.xlu0 %799, %v24_v11   ;;  %393 = vperm.xlu1 %797, %v21_v8  }
  0x4c   :  { %211 = vperm.xlu0 %799, %v26_v13   ;;  %401 = vperm.xlu1 %797, %v23_v10  }
  0x50   :  { %641 = vperm.xlu0 %799, %v28_v16   ;;  %409 = vperm.xlu1 %797, %v25_v12  }
  0x54   :  { %656 = vperm.xlu0 %799, %v31_v17   ;;  %800 = vset.pattern.permute.xlu1 %v802_v1  ;;  %v924_v1 = vrot.slane %v88_v55, %v141_v50 }
  0x55   :  { %636 = vperm.xlu1 %800, %v27_v18  }
  0x58   :  { %666 = vperm.xlu0 %799, %v33_v19  }
  0x59   :  { %646 = vperm.xlu1 %800, %v29_v20  }
  0x5c   :  { %676 = vperm.xlu0 %799, %v35_v21  }
  0x5d   :  { %651 = vperm.xlu1 %800, %v30_v22  }
  0x60   :  { %686 = vperm.xlu0 %799, %v37_v23  }
  0x61   :  { %661 = vperm.xlu1 %800, %v32_v24  }
  0x64   :  { %696 = vperm.xlu0 %799, %v39_v25  }
  0x65   :  { %671 = vperm.xlu1 %800, %v34_v26  }
  0x69   :  { %681 = vperm.xlu1 %800, %v36_v27  }
  0x6d   :  { %691 = vperm.xlu1 %800, %v38_v28  }
  0x81   :  { %v162_v29 = vpop.permute.xlu1 %161  ;;  %v256_v30 = vpop.permute.xlu0 %255 }
  0x82   :  { %v935_v8 = vmul.f32 %v162_v29, %v918_v62  ;;  %v938_v9 = vmul.f32 %v162_v29, %v920_v63  ;;  %v941_v10 = vmul.f32 %v922_v0, %v162_v29  ;;  %v944_v11 = vmul.f32 %v924_v1, %v162_v29 }
  0x83   :  { %v947_v12 = vmul.f32 %v256_v30, %v922_v0  ;;  %v950_v13 = vmul.f32 %v256_v30, %v924_v1  ;;  %v953_v14 = vmul.f32 %v926_v2, %v256_v30  ;;  %v956_v15 = vmul.f32 %v928_v3, %v256_v30 }
  0x85   :  { %v167_v34 = vpop.permute.xlu1 %166  ;;  %v268_v35 = vpop.permute.xlu0 %267 }
  0x86   :  { %v959_v16 = vmul.f32 %v167_v34, %v918_v62  ;;  %v962_v17 = vmul.f32 %v167_v34, %v920_v63  ;;  %v965_v18 = vmul.f32 %v922_v0, %v167_v34  ;;  %v968_v19 = vmul.f32 %v924_v1, %v167_v34 }
  0x87   :  { %v971_v20 = vmul.f32 %v268_v35, %v922_v0  ;;  %v974_v21 = vmul.f32 %v268_v35, %v924_v1  ;;  %v977_v22 = vmul.f32 %v926_v2, %v268_v35  ;;  %v980_v23 = vmul.f32 %v928_v3, %v268_v35 }
  0x89   :  { %v177_v41 = vpop.permute.xlu1 %176  ;;  %v276_v42 = vpop.permute.xlu0 %275  ;;  %1666 = vst [vmem:[#allocation2_spill] sm:$0xff] %v977_v22  ;;  %1667 = vst [vmem:[#allocation3_spill] sm:$0xff] %v980_v23 }
  0x8a   :  { %v983_v26 = vmul.f32 %v177_v41, %v918_v62  ;;  %v986_v27 = vmul.f32 %v177_v41, %v920_v63  ;;  %v989_v28 = vmul.f32 %v922_v0, %v177_v41  ;;  %v992_v29 = vmul.f32 %v924_v1, %v177_v41 }
  0x8b   :  { %v995_v30 = vmul.f32 %v276_v42, %v922_v0  ;;  %v998_v31 = vmul.f32 %v276_v42, %v924_v1  ;;  %v1001_v32 = vmul.f32 %v926_v2, %v276_v42  ;;  %v1004_v33 = vmul.f32 %v928_v3, %v276_v42 }
  0x8d   :  { %v187_v48 = vpop.permute.xlu1 %186  ;;  %v284_v49 = vpop.permute.xlu0 %283  ;;  %1668 = vst [vmem:[#allocation4_spill] sm:$0xff] %v995_v30  ;;  %1669 = vst [vmem:[#allocation5_spill] sm:$0xff] %v998_v31 }
  0x8e   :  { %1670 = vst [vmem:[#allocation6_spill] sm:$0xff] %v1001_v32  ;;  %1671 = vst [vmem:[#allocation7_spill] sm:$0xff] %v1004_v33  ;;  %v1007_v34 = vmul.f32 %v187_v48, %v918_v62  ;;  %v1010_v35 = vmul.f32 %v187_v48, %v920_v63  ;;  %v1013_v36 = vmul.f32 %v922_v0, %v187_v48 }
  0x8f   :  { %v1016_v37 = vmul.f32 %v924_v1, %v187_v48  ;;  %v1019_v38 = vmul.f32 %v284_v49, %v922_v0  ;;  %v1022_v39 = vmul.f32 %v284_v49, %v924_v1  ;;  %v1025_v40 = vmul.f32 %v926_v2, %v284_v49 }
  0x90   :  { %v1028_v41 = vmul.f32 %v928_v3, %v284_v49 }
  0x91   :  { %v197_v58 = vpop.permute.xlu1 %196  ;;  %v292_v59 = vpop.permute.xlu0 %291  ;;  %1672 = vst [vmem:[#allocation8_spill] sm:$0xff] %v1019_v38  ;;  %1673 = vst [vmem:[#allocation9_spill] sm:$0xff] %v1022_v39 }
  0x92   :  { %1674 = vst [vmem:[#allocation10_spill] sm:$0xff] %v1025_v40  ;;  %1675 = vst [vmem:[#allocation11_spill] sm:$0xff] %v1028_v41  ;;  %v1031_v44 = vmul.f32 %v197_v58, %v918_v62  ;;  %v1034_v45 = vmul.f32 %v197_v58, %v920_v63  ;;  %v1037_v46 = vmul.f32 %v922_v0, %v197_v58 }
  0x93   :  { %v1040_v47 = vmul.f32 %v924_v1, %v197_v58  ;;  %v1043_v48 = vmul.f32 %v292_v59, %v922_v0  ;;  %v1046_v49 = vmul.f32 %v292_v59, %v924_v1  ;;  %v1049_v50 = vmul.f32 %v926_v2, %v292_v59 }
  0x94   :  { %v1052_v51 = vmul.f32 %v928_v3, %v292_v59 }
  0x95   :  { %v207_v4 = vpop.permute.xlu1 %206  ;;  %v300_v5 = vpop.permute.xlu0 %299  ;;  %1676 = vst [vmem:[#allocation12_spill] sm:$0xff] %v1043_v48  ;;  %1677 = vst [vmem:[#allocation13_spill] sm:$0xff] %v1046_v49 }
  0x96   :  { %1678 = vst [vmem:[#allocation14_spill] sm:$0xff] %v1049_v50  ;;  %1679 = vst [vmem:[#allocation15_spill] sm:$0xff] %v1052_v51  ;;  %v1055_v52 = vmul.f32 %v207_v4, %v918_v62  ;;  %v1058_v53 = vmul.f32 %v207_v4, %v920_v63  ;;  %v1061_v54 = vmul.f32 %v922_v0, %v207_v4 }
  0x97   :  { %v1064_v55 = vmul.f32 %v924_v1, %v207_v4  ;;  %v1067_v56 = vmul.f32 %v300_v5, %v922_v0  ;;  %v1070_v57 = vmul.f32 %v300_v5, %v924_v1  ;;  %v1073_v58 = vmul.f32 %v926_v2, %v300_v5 }
  0x98   :  { %v1076_v59 = vmul.f32 %v928_v3, %v300_v5 }
  0x99   :  { %1680 = vst [vmem:[#allocation16_spill] sm:$0xff] %v1067_v56  ;;  %1681 = vst [vmem:[#allocation17_spill] sm:$0xff] %v1070_v57 }
  0x9a   :  { %v370_v24 = vpop.permute.xlu0 %369  ;;  %v252_v25 = vpop.permute.xlu1 %251  ;;  %1682 = vst [vmem:[#allocation18_spill] sm:$0xff] %v1073_v58  ;;  %1683 = vst [vmem:[#allocation19_spill] sm:$0xff] %v1076_v59 }
  0x9b   :  { %v1079_v51 = vmul.f32 %v370_v24, %v926_v2  ;;  %v1082_v4 = vmul.f32 %v370_v24, %v928_v3  ;;  %v1085_v50 = vmul.f32 %v930_v6, %v370_v24  ;;  %v1088_v56 = vmul.f32 %v932_v7, %v370_v24 }
  0x9c   :  { %v1095_v49 = vmul.f32 %v252_v25, %v922_v0  ;;  %v1098_v48 = vmul.f32 %v252_v25, %v924_v1  ;;  %v1101_v41 = vmul.f32 %v926_v2, %v252_v25  ;;  %v1104_v24 = vmul.f32 %v928_v3, %v252_v25 }
  0x9e   :  { %v382_v42 = vpop.permute.xlu0 %381  ;;  %v260_v43 = vpop.permute.xlu1 %259 }
  0x9f   :  { %v304_v57 = vmul.f32 %v260_v43, %v922_v0  ;;  %v317_v58 = vmul.f32 %v260_v43, %v924_v1  ;;  %v496_v5 = vmul.f32 %v926_v2, %v260_v43  ;;  %v509_v59 = vmul.f32 %v928_v3, %v260_v43 }
  0xa0   :  { %v1107_v40 = vmul.f32 %v382_v42, %v926_v2  ;;  %v1110_v39 = vmul.f32 %v382_v42, %v928_v3  ;;  %v1113_v43 = vmul.f32 %v930_v6, %v382_v42  ;;  %v1116_v38 = vmul.f32 %v932_v7, %v382_v42 }
  0xa1   :  { %v1132_v42 = vadd.f32 %v509_v59, %v944_v11 }
  0xa2   :  { %v390_v60 = vpop.permute.xlu0 %389  ;;  %v264_v61 = vpop.permute.xlu1 %263  ;;  %1684 = vst [vmem:[#allocation20_spill] sm:$0xff] %v1107_v40  ;;  %1685 = vst [vmem:[#allocation21_spill] sm:$0xff] %v1110_v39  ;;  %v1123_v40 = vadd.f32 %v304_v57, %v935_v8  ;;  %v1126_v39 = vadd.f32 %v317_v58, %v938_v9 }
  0xa3   :  { %1686 = vst [vmem:[#allocation22_spill] sm:$0xff] %v1113_v43  ;;  %1687 = vst [vmem:[#allocation23_spill] sm:$0xff] %v1116_v38  ;;  %v305_v31 = vmul.f32 %v264_v61, %v922_v0  ;;  %v318_v30 = vmul.f32 %v264_v61, %v924_v1  ;;  %v497_v25 = vmul.f32 %v926_v2, %v264_v61 }
  0xa4   :  { %v510_v23 = vmul.f32 %v928_v3, %v264_v61  ;;  %v1129_v43 = vadd.f32 %v496_v5, %v941_v10  ;;  %1689 = vst [vmem:[#allocation25_spill] sm:$0xff] %v1132_v42  ;;  %v1135_v38 = vmul.f32 %v390_v60, %v926_v2  ;;  %v1138_v22 = vmul.f32 %v390_v60, %v928_v3 }
  0xa5   :  { %v1141_v61 = vmul.f32 %v930_v6, %v390_v60  ;;  %v1144_v8 = vmul.f32 %v932_v7, %v390_v60  ;;  %v1151_v5 = vadd.f32 %v305_v31, %v959_v16  ;;  %v1154_v42 = vadd.f32 %v318_v30, %v962_v17 }
  0xa6   :  { %v398_v33 = vpop.permute.xlu0 %397  ;;  %v272_v32 = vpop.permute.xlu1 %271  ;;  %1688 = vst [vmem:[#allocation24_spill] sm:$0xff] %v1129_v43  ;;  %1690 = vst [vmem:[#allocation26_spill] sm:$0xff] %v1138_v22  ;;  %v1157_v43 = vadd.f32 %v497_v25, %v965_v18  ;;  %v1160_v60 = vadd.f32 %v510_v23, %v968_v19 }
  0xa7   :  { %1691 = vst [vmem:[#allocation27_spill] sm:$0xff] %v1141_v61  ;;  %1692 = vst [vmem:[#allocation28_spill] sm:$0xff] %v1144_v8  ;;  %v307_v9 = vmul.f32 %v272_v32, %v922_v0  ;;  %v320_v10 = vmul.f32 %v272_v32, %v924_v1  ;;  %v499_v57 = vmul.f32 %v926_v2, %v272_v32 }
  0xa8   :  { %v512_v11 = vmul.f32 %v928_v3, %v272_v32  ;;  %1693 = vst [vmem:[#allocation29_spill] sm:$0xff] %v1154_v42  ;;  %1694 = vst [vmem:[#allocation30_spill] sm:$0xff] %v1157_v43  ;;  %v1167_v16 = vmul.f32 %v398_v33, %v926_v2  ;;  %v1170_v17 = vmul.f32 %v398_v33, %v928_v3 }
  0xa9   :  { %1695 = vst [vmem:[#allocation31_spill] sm:$0xff] %v1160_v60  ;;  %v1173_v18 = vmul.f32 %v930_v6, %v398_v33  ;;  %v1176_v19 = vmul.f32 %v932_v7, %v398_v33  ;;  %v1179_v31 = vadd.f32 %v307_v9, %v983_v26  ;;  %v1182_v25 = vadd.f32 %v320_v10, %v986_v27 }
  0xaa   :  { %v406_v58 = vpop.permute.xlu0 %405  ;;  %v280_v59 = vpop.permute.xlu1 %279  ;;  %v1188_v60 = vadd.f32 %v512_v11, %v992_v29 }
  0xab   :  { %v309_v8 = vmul.f32 %v280_v59, %v922_v0  ;;  %v322_v61 = vmul.f32 %v280_v59, %v924_v1  ;;  %v501_v32 = vmul.f32 %v926_v2, %v280_v59  ;;  %v514_v22 = vmul.f32 %v928_v3, %v280_v59 }
  0xac   :  { %v1185_v59 = vadd.f32 %v499_v57, %v989_v28  ;;  %1697 = vst [vmem:[#allocation33_spill] sm:$0xff] %v1188_v60  ;;  %v1191_v43 = vmul.f32 %v406_v58, %v926_v2  ;;  %v1194_v33 = vmul.f32 %v406_v58, %v928_v3  ;;  %v1197_v42 = vmul.f32 %v930_v6, %v406_v58 }
  0xad   :  { %v1200_v26 = vmul.f32 %v932_v7, %v406_v58  ;;  %v1203_v27 = vadd.f32 %v309_v8, %v1007_v34  ;;  %v1206_v28 = vadd.f32 %v322_v61, %v1010_v35  ;;  %v1209_v29 = vadd.f32 %v501_v32, %v1013_v36 }
  0xae   :  { %v414_v23 = vpop.permute.xlu0 %413  ;;  %v288_v30 = vpop.permute.xlu1 %287  ;;  %1696 = vst [vmem:[#allocation32_spill] sm:$0xff] %v1185_v59  ;;  %1698 = vst [vmem:[#allocation34_spill] sm:$0xff] %v1197_v42  ;;  %v1212_v9 = vadd.f32 %v514_v22, %v1016_v37  ;;  %v1727_v59 = vld [vmem:[#allocation6_spill] sm:$0xff]  ;;  %v1728_v42 = vld [vmem:[#allocation7_spill] sm:$0xff] }
  0xaf   :  { %1699 = vst [vmem:[#allocation35_spill] sm:$0xff] %v1200_v26  ;;  %1700 = vst [vmem:[#allocation36_spill] sm:$0xff] %v1203_v27  ;;  %v311_v10 = vmul.f32 %v288_v30, %v922_v0  ;;  %v324_v57 = vmul.f32 %v288_v30, %v924_v1  ;;  %v503_v11 = vmul.f32 %v926_v2, %v288_v30 }
  0xb0   :  { %1701 = vst [vmem:[#allocation37_spill] sm:$0xff] %v1206_v28  ;;  %1702 = vst [vmem:[#allocation38_spill] sm:$0xff] %v1209_v29  ;;  %v516_v58 = vmul.f32 %v928_v3, %v288_v30  ;;  %v1219_v34 = vmul.f32 %v414_v23, %v926_v2  ;;  %v1222_v35 = vmul.f32 %v414_v23, %v928_v3 }
  0xb1   :  { %1703 = vst [vmem:[#allocation39_spill] sm:$0xff] %v1212_v9  ;;  %v1225_v36 = vmul.f32 %v930_v6, %v414_v23  ;;  %v1228_v22 = vmul.f32 %v932_v7, %v414_v23  ;;  %v1239_v23 = vadd.f32 %v311_v10, %v1031_v44 }
  0xb2   :  { %1704 = vst [vmem:[#allocation40_spill] sm:$0xff] %v1219_v34  ;;  %1705 = vst [vmem:[#allocation41_spill] sm:$0xff] %v1222_v35  ;;  %v296_v37 = vpop.permute.xlu1 %295  ;;  %v1245_v35 = vadd.f32 %v503_v11, %v1037_v46 }
  0xb3   :  { %1706 = vst [vmem:[#allocation42_spill] sm:$0xff] %v1225_v36  ;;  %1707 = vst [vmem:[#allocation43_spill] sm:$0xff] %v1228_v22  ;;  %v313_v61 = vmul.f32 %v296_v37, %v922_v0  ;;  %v326_v8 = vmul.f32 %v296_v37, %v924_v1  ;;  %v505_v32 = vmul.f32 %v926_v2, %v296_v37  ;;  %v152_v9 = vpop.permute.xlu0 %151 }
  0xb4   :  { %v518_v30 = vmul.f32 %v928_v3, %v296_v37  ;;  %v214_v29 = vmul.f32 %v152_v9, %v918_v62  ;;  %v227_v28 = vmul.f32 %v152_v9, %v920_v63  ;;  %v468_v27 = vmul.f32 %v922_v0, %v152_v9  ;;  %1708 = vst [vmem:[#allocation44_spill] sm:$0xff] %v1239_v23 }
  0xb5   :  { %v481_v36 = vmul.f32 %v924_v1, %v152_v9  ;;  %v1242_v22 = vadd.f32 %v324_v57, %v1034_v45  ;;  %1710 = vst [vmem:[#allocation46_spill] sm:$0xff] %v1245_v35  ;;  %v1248_v37 = vadd.f32 %v516_v58, %v1040_v47  ;;  %v1251_v34 = vadd.f32 %v313_v61, %v1055_v52 }
  0xb6   :  { %v1254_v60 = vadd.f32 %v326_v8, %v1058_v53  ;;  %v1257_v9 = vadd.f32 %v505_v32, %v1061_v54  ;;  %v1260_v44 = vadd.f32 %v518_v30, %v1064_v55  ;;  %v328_v46 = vadd.f32 %v1095_v49, %v214_v29 }
  0xb7   :  { %1709 = vst [vmem:[#allocation45_spill] sm:$0xff] %v1242_v22  ;;  %1711 = vst [vmem:[#allocation47_spill] sm:$0xff] %v1248_v37  ;;  %v157_v45 = vpop.permute.xlu0 %156  ;;  %v366_v10 = vpop.permute.xlu1 %365  ;;  %v341_v57 = vadd.f32 %v1098_v48, %v227_v28  ;;  %v520_v47 = vadd.f32 %v1101_v41, %v468_v27  ;;  %v533_v52 = vadd.f32 %v1104_v24, %v481_v36  ;;  %v1726_v37 = vld [vmem:[#allocation5_spill] sm:$0xff] }
  0xb8   :  { %1712 = vst [vmem:[#allocation48_spill] sm:$0xff] %v1251_v34  ;;  %1713 = vst [vmem:[#allocation49_spill] sm:$0xff] %v1254_v60  ;;  %v215_v11 = vmul.f32 %v157_v45, %v918_v62  ;;  %v228_v53 = vmul.f32 %v157_v45, %v920_v63  ;;  %v469_v54 = vmul.f32 %v922_v0, %v157_v45  ;;  %v1721_v60 = vld [vmem:[#allocation23_spill] sm:$0xff]  ;;  %v1725_v34 = vld [vmem:[#allocation4_spill] sm:$0xff] }
  0xb9   :  { %1714 = vst [vmem:[#allocation50_spill] sm:$0xff] %v1257_v9  ;;  %1715 = vst [vmem:[#allocation51_spill] sm:$0xff] %v1260_v44  ;;  %v482_v58 = vmul.f32 %v924_v1, %v157_v45  ;;  %v416_v55 = vmul.f32 %v366_v10, %v926_v2  ;;  %v429_v61 = vmul.f32 %v366_v10, %v928_v3  ;;  %v1720_v44 = vld [vmem:[#allocation22_spill] sm:$0xff] }
  0xba   :  { %v556_v49 = vmul.f32 %v930_v6, %v366_v10  ;;  %v569_v48 = vmul.f32 %v932_v7, %v366_v10  ;;  %v329_v41 = vadd.f32 %v947_v12, %v215_v11  ;;  %v342_v24 = vadd.f32 %v950_v13, %v228_v53 }
  0xbb   :  { %v521_v27 = vadd.f32 %v953_v14, %v469_v54  ;;  %v534_v28 = vadd.f32 %v956_v15, %v482_v58  ;;  %v172_v29 = vpop.permute.xlu0 %171  ;;  %v374_v36 = vpop.permute.xlu1 %373  ;;  %v1278_v8 = vadd.f32 %v416_v55, %v328_v46  ;;  %v1280_v32 = vadd.f32 %v429_v61, %v341_v57 }
  0xbc   :  { %v1282_v30 = vadd.f32 %v556_v49, %v520_v47  ;;  %v1284_v45 = vadd.f32 %v569_v48, %v533_v52  ;;  %v218_v10 = vmul.f32 %v172_v29, %v918_v62  ;;  %v231_v12 = vmul.f32 %v172_v29, %v920_v63  ;;  %v1716_v48 = vld [vmem:[#allocation2_spill] sm:$0xff] }
  0xbd   :  { %v472_v13 = vmul.f32 %v922_v0, %v172_v29  ;;  %v485_v14 = vmul.f32 %v924_v1, %v172_v29  ;;  %v418_v15 = vmul.f32 %v374_v36, %v926_v2  ;;  %v431_v11 = vmul.f32 %v374_v36, %v928_v3 }
  0xbe   :  { %v1293_v46 = vmul.f32 %v930_v6, %v374_v36  ;;  %v1296_v57 = vmul.f32 %v932_v7, %v374_v36  ;;  %v1299_v47 = vadd.f32 %v1079_v51, %v329_v41  ;;  %v1302_v52 = vadd.f32 %v1082_v4, %v342_v24  ;;  %v1717_v36 = vld [vmem:[#allocation3_spill] sm:$0xff] }
  0xbf   :  { %v1305_v53 = vadd.f32 %v1085_v50, %v521_v27  ;;  %v1308_v54 = vadd.f32 %v1088_v56, %v534_v28  ;;  %v182_v58 = vpop.permute.xlu0 %181  ;;  %v378_v55 = vpop.permute.xlu1 %377  ;;  %v332_v61 = vadd.f32 %v971_v20, %v218_v10  ;;  %v345_v49 = vadd.f32 %v974_v21, %v231_v12  ;;  %v1718_v12 = vld [vmem:[#allocation20_spill] sm:$0xff] }
  0xc0   :  { %v524_v29 = vadd.f32 %v1716_v48, %v472_v13  ;;  %v537_v51 = vadd.f32 %v1717_v36, %v485_v14  ;;  %v220_v41 = vmul.f32 %v182_v58, %v918_v62  ;;  %v233_v4 = vmul.f32 %v182_v58, %v920_v63  ;;  %v1719_v14 = vld [vmem:[#allocation21_spill] sm:$0xff] }
  0xc1   :  { %v474_v50 = vmul.f32 %v922_v0, %v182_v58  ;;  %v487_v24 = vmul.f32 %v924_v1, %v182_v58  ;;  %v1319_v56 = vmul.f32 %v378_v55, %v926_v2  ;;  %v1322_v27 = vmul.f32 %v378_v55, %v928_v3 }
  0xc2   :  { %v1325_v20 = vmul.f32 %v930_v6, %v378_v55  ;;  %v1328_v21 = vmul.f32 %v932_v7, %v378_v55  ;;  %v1335_v13 = vadd.f32 %v1718_v12, %v332_v61  ;;  %v1338_v58 = vadd.f32 %v1719_v14, %v345_v49 }
  0xc3   :  { %v192_v48 = vpop.permute.xlu0 %191  ;;  %v386_v36 = vpop.permute.xlu1 %385  ;;  %v1341_v9 = vadd.f32 %v1720_v44, %v524_v29  ;;  %v1344_v55 = vadd.f32 %v1721_v60, %v537_v51  ;;  %v347_v35 = vadd.f32 %v1726_v37, %v233_v4  ;;  %v526_v26 = vadd.f32 %v1727_v59, %v474_v50  ;;  %v1735_v50 = vld [vmem:[#allocation28_spill] sm:$0xff] }
  0xc4   :  { %v222_v61 = vmul.f32 %v192_v48, %v918_v62  ;;  %v235_v12 = vmul.f32 %v192_v48, %v920_v63  ;;  %v476_v49 = vmul.f32 %v922_v0, %v192_v48  ;;  %v489_v14 = vmul.f32 %v924_v1, %v192_v48 }
  0xc5   :  { %v1355_v44 = vmul.f32 %v386_v36, %v926_v2  ;;  %v1358_v60 = vmul.f32 %v386_v36, %v928_v3  ;;  %v1361_v29 = vmul.f32 %v930_v6, %v386_v36  ;;  %v1364_v51 = vmul.f32 %v932_v7, %v386_v36 }
  0xc6   :  { %v334_v48 = vadd.f32 %v1725_v34, %v220_v41  ;;  %v1378_v36 = vadd.f32 %v431_v11, %v1126_v39  ;;  %v1733_v11 = vld [vmem:[#allocation26_spill] sm:$0xff] }
  0xc7   :  { %1722 = vst [vmem:[#allocation2_spill] sm:$0xff] %v1358_v60  ;;  %1723 = vst [vmem:[#allocation3_spill] sm:$0xff] %v1361_v29  ;;  %v202_v22 = vpop.permute.xlu0 %201  ;;  %v394_v23 = vpop.permute.xlu1 %393  ;;  %v539_v60 = vadd.f32 %v1728_v42, %v487_v24  ;;  %v1375_v29 = vadd.f32 %v418_v15, %v1123_v40  ;;  %v1404_v41 = vadd.f32 %v1733_v11, %v347_v35  ;;  %v1739_v35 = vld [vmem:[#allocation9_spill] sm:$0xff] }
  0xc8   :  { %1724 = vst [vmem:[#allocation20_spill] sm:$0xff] %v1364_v51  ;;  %v224_v10 = vmul.f32 %v202_v22, %v918_v62  ;;  %v237_v28 = vmul.f32 %v202_v22, %v920_v63  ;;  %v1383_v34 = vmul.f32 %v922_v0, %v202_v22  ;;  %v1386_v37 = vmul.f32 %v924_v1, %v202_v22  ;;  %v1734_v22 = vld [vmem:[#allocation27_spill] sm:$0xff]  ;;  %v1736_v51 = vld [vmem:[#allocation24_spill] sm:$0xff] }
  0xc9   :  { %v1389_v59 = vmul.f32 %v394_v23, %v926_v2  ;;  %v1392_v42 = vmul.f32 %v394_v23, %v928_v3  ;;  %v1395_v40 = vmul.f32 %v930_v6, %v394_v23  ;;  %v1398_v39 = vmul.f32 %v932_v7, %v394_v23  ;;  %v1737_v23 = vld [vmem:[#allocation25_spill] sm:$0xff] }
  0xca   :  { %v1401_v15 = vadd.f32 %v1135_v38, %v334_v48  ;;  %v1407_v4 = vadd.f32 %v1734_v22, %v526_v26  ;;  %v1410_v24 = vadd.f32 %v1735_v50, %v539_v60  ;;  %v1738_v38 = vld [vmem:[#allocation8_spill] sm:$0xff]  ;;  %v349_v11 = vadd.f32 %v1739_v35, %v235_v12 }
  0xcb   :  { %1729 = vst [vmem:[#allocation21_spill] sm:$0xff] %v1389_v59  ;;  %1730 = vst [vmem:[#allocation22_spill] sm:$0xff] %v1392_v42  ;;  %v212_v42 = vpop.permute.xlu0 %211  ;;  %v402_v59 = vpop.permute.xlu1 %401  ;;  %v336_v48 = vadd.f32 %v1738_v38, %v222_v61  ;;  %v1740_v38 = vld [vmem:[#allocation10_spill] sm:$0xff] }
  0xcc   :  { %1731 = vst [vmem:[#allocation23_spill] sm:$0xff] %v1395_v40  ;;  %1732 = vst [vmem:[#allocation4_spill] sm:$0xff] %v1398_v39  ;;  %v1414_v40 = vadd.f32 %v1293_v46, %v1736_v51  ;;  %v1418_v39 = vadd.f32 %v1296_v57, %v1737_v23  ;;  %v1423_v26 = vmul.f32 %v212_v42, %v918_v62 }
  0xcd   :  { %v1426_v60 = vmul.f32 %v212_v42, %v920_v63  ;;  %v1429_v22 = vmul.f32 %v922_v0, %v212_v42  ;;  %v1432_v46 = vmul.f32 %v924_v1, %v212_v42  ;;  %v1435_v51 = vmul.f32 %v402_v59, %v926_v2 }
  0xce   :  { %v1438_v57 = vmul.f32 %v402_v59, %v928_v3  ;;  %v1441_v61 = vmul.f32 %v930_v6, %v402_v59  ;;  %v1444_v62 = vmul.f32 %v932_v7, %v402_v59  ;;  %v614_v63 = vmax.f32 %v1401_v15, %v1407_v4  ;;  %v1741_v15 = vld [vmem:[#allocation11_spill] sm:$0xff] }
  0xcf   :  { %v627_v0 = vmax.f32 %v1404_v41, %v1410_v24  ;;  %v610_v1 = vmax.f32 %v1375_v29, %v1414_v40  ;;  %v623_v12 = vmax.f32 %v1378_v36, %v1418_v39  ;;  %v642_v42 = vpop.permute.xlu0 %641  ;;  %v410_v50 = vpop.permute.xlu1 %409  ;;  %v1455_v23 = vadd.f32 %v1167_v16, %v336_v48 }
  0xd0   :  { %v1458_v59 = vadd.f32 %v1170_v17, %v349_v11  ;;  %v528_v35 = vadd.f32 %v1740_v38, %v476_v49  ;;  %v541_v4 = vadd.f32 %v1741_v15, %v489_v14  ;;  %v1742_v41 = vmax.f32 %v1299_v47, %v1305_v53  ;;  %v1745_v11 = vld [vmem:[#allocation30_spill] sm:$0xff] }
  0xd1   :  { %v1743_v29 = vmax.f32 %v1302_v52, %v1308_v54  ;;  %v1469_v40 = vmul.f32 %v410_v50, %v926_v2  ;;  %v1472_v16 = vmul.f32 %v410_v50, %v928_v3  ;;  %v1475_v17 = vmul.f32 %v930_v6, %v410_v50  ;;  %v1744_v2 = vld [vmem:[#allocation29_spill] sm:$0xff] }
  0xd2   :  { %v700_v24 = vadd.f32 %v642_v42, %v1742_v41  ;;  %v1478_v49 = vmul.f32 %v932_v7, %v410_v50  ;;  %v590_v14 = vadd.f32 %v1173_v18, %v528_v35  ;;  %v603_v47 = vadd.f32 %v1176_v19, %v541_v4 }
  0xd3   :  { %v713_v36 = vadd.f32 %v642_v42, %v1743_v29  ;;  %v445_v52 = vadd.f32 %v1319_v56, %v1151_v5  ;;  %v458_v54 = vadd.f32 %v1322_v27, %v1744_v2  ;;  %v657_v3 = vpop.permute.xlu0 %656  ;;  %v585_v7 = vadd.f32 %v1325_v20, %v1745_v11  ;;  %v1746_v42 = vld [vmem:[#allocation31_spill] sm:$0xff]  ;;  %v1758_v2 = vld [vmem:[#allocation32_spill] sm:$0xff] }
  0xd4   :  { %v726_v53 = vmax.f32 %v700_v24, 0.0  ;;  %v616_v48 = vmax.f32 %v1455_v23, %v590_v14  ;;  %v629_v6 = vmax.f32 %v1458_v59, %v603_v47  ;;  %v598_v18 = vadd.f32 %v1328_v21, %v1746_v42  ;;  %v637_v20 = vpop.permute.xlu1 %636  ;;  %v1749_v21 = vld [vmem:[#allocation12_spill] sm:$0xff]  ;;  %v1750_v23 = vld [vmem:[#allocation13_spill] sm:$0xff] }
  0xd5   :  { %v739_v39 = vmax.f32 %v713_v36, 0.0  ;;  %v1747_v5 = vmax.f32 %v1335_v13, %v1341_v9  ;;  %v1748_v56 = vmax.f32 %v1338_v58, %v1344_v55  ;;  %v338_v50 = vadd.f32 %v1749_v21, %v224_v10  ;;  %v1761_v11 = vld [vmem:[#allocation20_spill] sm:$0xff] }
  0xd6   :  { %753 = vst.msk [vmem:[%s1665_s3 + $0x8] sm:$0xff] %vm751_vm0, %v726_v53  ;;  %v351_v59 = vadd.f32 %v1750_v23, %v237_v28  ;;  %v1751_v38 = vmax.f32 %v1278_v8, %v1282_v30  ;;  %v1752_v15 = vmax.f32 %v1280_v32, %v1284_v45  ;;  %v611_v41 = vmax.f32 %v445_v52, %v585_v7  ;;  %v1753_v28 = vld [vmem:[#allocation14_spill] sm:$0xff]  ;;  %v1754_v8 = vld [vmem:[#allocation15_spill] sm:$0xff] }
  0xd7   :  { %767 = vst.msk [vmem:[%s1665_s3 + $0x70] sm:$0xff] %vm751_vm0, %v739_v39  ;;  %v703_v19 = vadd.f32 %v657_v3, %v1747_v5  ;;  %v716_v27 = vadd.f32 %v657_v3, %v1748_v56  ;;  %v624_v9 = vmax.f32 %v458_v54, %v598_v18  ;;  %v452_v58 = vadd.f32 %v1191_v43, %v338_v50  ;;  %v667_v36 = vpop.permute.xlu0 %666  ;;  %v1757_v39 = vld [vmem:[#allocation35_spill] sm:$0xff]  ;;  %v1760_v3 = vld [vmem:[#allocation33_spill] sm:$0xff] }
  0xd8   :  { %v699_v35 = vadd.f32 %v637_v20, %v1751_v38  ;;  %v712_v4 = vadd.f32 %v637_v20, %v1752_v15  ;;  %v465_v55 = vadd.f32 %v1194_v33, %v351_v59  ;;  %v530_v14 = vadd.f32 %v1753_v28, %v1383_v34  ;;  %v647_v32 = vpop.permute.xlu1 %646  ;;  %v1755_v34 = vld [vmem:[#allocation2_spill] sm:$0xff]  ;;  %v1762_v59 = vld [vmem:[#allocation16_spill] sm:$0xff] }
  0xd9   :  { %v729_v13 = vmax.f32 %v703_v19, 0.0  ;;  %v742_v24 = vmax.f32 %v716_v27, 0.0  ;;  %v543_v30 = vadd.f32 %v1754_v8, %v1386_v37  ;;  %v705_v43 = vadd.f32 %v667_v36, %v614_v63  ;;  %v1769_v8 = vld [vmem:[#allocation43_spill] sm:$0xff] }
  0xda   :  { %v725_v29 = vmax.f32 %v699_v35, 0.0  ;;  %v738_v10 = vmax.f32 %v712_v4, 0.0  ;;  %v718_v33 = vadd.f32 %v667_v36, %v627_v0  ;;  %v447_v45 = vadd.f32 %v1355_v44, %v1179_v31  ;;  %v1756_v0 = vld [vmem:[#allocation34_spill] sm:$0xff]  ;;  %v1767_v36 = vld [vmem:[#allocation41_spill] sm:$0xff] }
  0xdb   :  { %756 = vst.msk [vmem:[%s1665_s3 + $0x20] sm:$0xff] %vm751_vm0, %v729_v13  ;;  %770 = vst.msk [vmem:[%s1665_s3 + $0x88] sm:$0xff] %vm751_vm0, %v742_v24  ;;  %v460_v47 = vadd.f32 %v1755_v34, %v1182_v25  ;;  %v701_v37 = vadd.f32 %v647_v32, %v610_v1  ;;  %v714_v63 = vadd.f32 %v647_v32, %v623_v12  ;;  %v731_v31 = vmax.f32 %v705_v43, 0.0  ;;  %v1759_v25 = vld [vmem:[#allocation3_spill] sm:$0xff]  ;;  %v677_v5 = vpop.permute.xlu0 %676  ;;  %v1764_v4 = vld [vmem:[#allocation18_spill] sm:$0xff] }
  0xdc   :  { %752 = vst.msk [vmem:[%s1665_s3] sm:$0xff] %vm751_vm0, %v725_v29  ;;  %766 = vst.msk [vmem:[%s1665_s3 + $0x68] sm:$0xff] %vm751_vm0, %v738_v10  ;;  %v592_v53 = vadd.f32 %v1756_v0, %v530_v14  ;;  %v605_v52 = vadd.f32 %v1757_v39, %v543_v30  ;;  %v744_v44 = vmax.f32 %v718_v33, 0.0  ;;  %v587_v54 = vadd.f32 %v1759_v25, %v1758_v2  ;;  %v652_v27 = vpop.permute.xlu1 %651  ;;  %v1765_v24 = vld [vmem:[#allocation19_spill] sm:$0xff]  ;;  %v1770_v32 = vld [vmem:[#allocation36_spill] sm:$0xff] }
  0xdd   :  { %v600_v7 = vadd.f32 %v1761_v11, %v1760_v3  ;;  %v727_v42 = vmax.f32 %v701_v37, 0.0  ;;  %v740_v18 = vmax.f32 %v714_v63, 0.0  ;;  %758 = vst.msk [vmem:[%s1665_s3 + $0x30] sm:$0xff] %vm751_vm0, %v731_v31  ;;  %v707_v1 = vadd.f32 %v677_v5, %v616_v48  ;;  %v1773_v37 = vld [vmem:[#allocation22_spill] sm:$0xff]  ;;  %v1776_v11 = vld [vmem:[#allocation39_spill] sm:$0xff] }
  0xde   :  { %v618_v19 = vmax.f32 %v452_v58, %v592_v53  ;;  %v631_v56 = vmax.f32 %v465_v55, %v605_v52  ;;  %772 = vst.msk [vmem:[%s1665_s3 + $0x98] sm:$0xff] %vm751_vm0, %v744_v44  ;;  %v720_v12 = vadd.f32 %v677_v5, %v629_v6  ;;  %v613_v20 = vmax.f32 %v447_v45, %v587_v54  ;;  %v1763_v6 = vld [vmem:[#allocation17_spill] sm:$0xff]  ;;  %v1774_v25 = vld [vmem:[#allocation38_spill] sm:$0xff]  ;;  %v1775_v54 = vld [vmem:[#allocation23_spill] sm:$0xff] }
  0xdf   :  { %v626_v21 = vmax.f32 %v460_v47, %v600_v7  ;;  %754 = vst.msk [vmem:[%s1665_s3 + $0x10] sm:$0xff] %vm751_vm0, %v727_v42  ;;  %768 = vst.msk [vmem:[%s1665_s3 + $0x78] sm:$0xff] %vm751_vm0, %v740_v18  ;;  %v702_v50 = vadd.f32 %v652_v27, %v611_v41  ;;  %v715_v23 = vadd.f32 %v652_v27, %v624_v9  ;;  %v733_v35 = vmax.f32 %v707_v1, 0.0  ;;  %v687_v10 = vpop.permute.xlu0 %686  ;;  %v1766_v41 = vld [vmem:[#allocation40_spill] sm:$0xff]  ;;  %v1771_v45 = vld [vmem:[#allocation21_spill] sm:$0xff] }
  0xe0   :  { %v340_v48 = vadd.f32 %v1762_v59, %v1423_v26  ;;  %v353_v38 = vadd.f32 %v1763_v6, %v1426_v60  ;;  %v746_v15 = vmax.f32 %v720_v12, 0.0  ;;  %v532_v13 = vadd.f32 %v1764_v4, %v1429_v22  ;;  %v662_v22 = vpop.permute.xlu1 %661  ;;  %v1772_v47 = vld [vmem:[#allocation37_spill] sm:$0xff]  ;;  %v1777_v7 = vld [vmem:[#allocation4_spill] sm:$0xff]  ;;  %v1781_v59 = vld [vmem:[#allocation47_spill] sm:$0xff] }
  0xe1   :  { %v545_v58 = vadd.f32 %v1765_v24, %v1432_v46  ;;  %v728_v55 = vmax.f32 %v702_v50, 0.0  ;;  %v741_v29 = vmax.f32 %v715_v23, 0.0  ;;  %760 = vst.msk [vmem:[%s1665_s3 + $0x40] sm:$0xff] %vm751_vm0, %v733_v35  ;;  %v709_v26 = vadd.f32 %v687_v10, %v618_v19  ;;  %v1768_v46 = vld [vmem:[#allocation42_spill] sm:$0xff]  ;;  %v1779_v12 = vld [vmem:[#allocation45_spill] sm:$0xff]  ;;  %v1782_v6 = vld [vmem:[#allocation48_spill] sm:$0xff] }
  0xe2   :  { %v454_v9 = vadd.f32 %v1766_v41, %v340_v48  ;;  %v467_v28 = vadd.f32 %v1767_v36, %v353_v38  ;;  %774 = vst.msk [vmem:[%s1665_s3 + $0xa8] sm:$0xff] %vm751_vm0, %v746_v15  ;;  %v722_v60 = vadd.f32 %v687_v10, %v631_v56  ;;  %v594_v14 = vadd.f32 %v1768_v46, %v532_v13  ;;  %v1778_v56 = vld [vmem:[#allocation44_spill] sm:$0xff]  ;;  %v1780_v50 = vld [vmem:[#allocation46_spill] sm:$0xff]  ;;  %v1783_v35 = vld [vmem:[#allocation49_spill] sm:$0xff] }
  0xe3   :  { %v607_v30 = vadd.f32 %v1769_v8, %v545_v58  ;;  %755 = vst.msk [vmem:[%s1665_s3 + $0x18] sm:$0xff] %vm751_vm0, %v728_v55  ;;  %769 = vst.msk [vmem:[%s1665_s3 + $0x80] sm:$0xff] %vm751_vm0, %v741_v29  ;;  %v704_v43 = vadd.f32 %v662_v22, %v613_v20  ;;  %v717_v33 = vadd.f32 %v662_v22, %v626_v21  ;;  %v735_v0 = vmax.f32 %v709_v26, 0.0  ;;  %v697_v2 = vpop.permute.xlu0 %696  ;;  %v1785_v55 = vld [vmem:[#allocation51_spill] sm:$0xff] }
  0xe4   :  { %v449_v34 = vadd.f32 %v1771_v45, %v1770_v32  ;;  %v462_v63 = vadd.f32 %v1773_v37, %v1772_v47  ;;  %v748_v53 = vmax.f32 %v722_v60, 0.0  ;;  %v620_v39 = vmax.f32 %v454_v9, %v594_v14  ;;  %v672_v19 = vpop.permute.xlu1 %671 }
  0xe5   :  { %v633_v52 = vmax.f32 %v467_v28, %v607_v30  ;;  %v730_v31 = vmax.f32 %v704_v43, 0.0  ;;  %v743_v44 = vmax.f32 %v717_v33, 0.0  ;;  %v589_v3 = vadd.f32 %v1775_v54, %v1774_v25  ;;  %762 = vst.msk [vmem:[%s1665_s3 + $0x50] sm:$0xff] %vm751_vm0, %v735_v0 }
  0xe6   :  { %v602_v42 = vadd.f32 %v1777_v7, %v1776_v11  ;;  %776 = vst.msk [vmem:[%s1665_s3 + $0xb8] sm:$0xff] %vm751_vm0, %v748_v53  ;;  %v711_v18 = vadd.f32 %v697_v2, %v620_v39  ;;  %v451_v1 = vadd.f32 %v1435_v51, %v1778_v56  ;;  %v464_v27 = vadd.f32 %v1438_v57, %v1779_v12 }
  0xe7   :  { %v724_v5 = vadd.f32 %v697_v2, %v633_v52  ;;  %757 = vst.msk [vmem:[%s1665_s3 + $0x28] sm:$0xff] %vm751_vm0, %v730_v31  ;;  %771 = vst.msk [vmem:[%s1665_s3 + $0x90] sm:$0xff] %vm751_vm0, %v743_v44  ;;  %v615_v20 = vmax.f32 %v449_v34, %v589_v3  ;;  %v591_v23 = vadd.f32 %v1441_v61, %v1780_v50 }
  0xe8   :  { %v628_v21 = vmax.f32 %v462_v63, %v602_v42  ;;  %v604_v51 = vadd.f32 %v1444_v62, %v1781_v59  ;;  %v737_v48 = vmax.f32 %v711_v18, 0.0  ;;  %v453_v38 = vadd.f32 %v1469_v40, %v1782_v6  ;;  %v682_v61 = vpop.permute.xlu1 %681  ;;  %v1784_v62 = vld [vmem:[#allocation50_spill] sm:$0xff] }
  0xe9   :  { %v750_v57 = vmax.f32 %v724_v5, 0.0  ;;  %v466_v15 = vadd.f32 %v1472_v16, %v1783_v35  ;;  %v706_v4 = vadd.f32 %v672_v19, %v615_v20  ;;  %v617_v24 = vmax.f32 %v451_v1, %v591_v23 }
  0xea   :  { %v719_v13 = vadd.f32 %v672_v19, %v628_v21  ;;  %v630_v58 = vmax.f32 %v464_v27, %v604_v51  ;;  %765 = vst.msk [vmem:[%s1665_s3 + $0x60] sm:$0xf] %vm764_vm1, %v737_v48  ;;  %v593_v40 = vadd.f32 %v1475_v17, %v1784_v62  ;;  %v606_v16 = vadd.f32 %v1478_v49, %v1785_v55 }
  0xeb   :  { %778 = vst.msk [vmem:[%s1665_s3 + $0xc8] sm:$0xf] %vm764_vm1, %v750_v57  ;;  %v732_v29 = vmax.f32 %v706_v4, 0.0  ;;  %v708_v41 = vadd.f32 %v682_v61, %v617_v24 }
  0xec   :  { %v745_v10 = vmax.f32 %v719_v13, 0.0  ;;  %v721_v9 = vadd.f32 %v682_v61, %v630_v58  ;;  %v619_v17 = vmax.f32 %v453_v38, %v593_v40  ;;  %v632_v26 = vmax.f32 %v466_v15, %v606_v16  ;;  %v692_v60 = vpop.permute.xlu1 %691 }
  0xed   :  { %759 = vst.msk [vmem:[%s1665_s3 + $0x38] sm:$0xff] %vm751_vm0, %v732_v29  ;;  %v734_v36 = vmax.f32 %v708_v41, 0.0 }
  0xee   :  { %773 = vst.msk [vmem:[%s1665_s3 + $0xa0] sm:$0xff] %vm751_vm0, %v745_v10  ;;  %v747_v28 = vmax.f32 %v721_v9, 0.0  ;;  %v710_v49 = vadd.f32 %v692_v60, %v619_v17  ;;  %v723_v22 = vadd.f32 %v692_v60, %v632_v26 }
  0xef   :  { %761 = vst.msk [vmem:[%s1665_s3 + $0x48] sm:$0xff] %vm751_vm0, %v734_v36 }
  0xf0   :  { %775 = vst.msk [vmem:[%s1665_s3 + $0xb0] sm:$0xff] %vm751_vm0, %v747_v28  ;;  %v736_v46 = vmax.f32 %v710_v49, 0.0  ;;  %v749_v14 = vmax.f32 %v723_v22, 0.0 }
  0xf2   :  { %763 = vst.msk [vmem:[%s1665_s3 + $0x58] sm:$0xff] %vm751_vm0, %v736_v46  ;;  %777 = vst.msk [vmem:[%s1665_s3 + $0xc0] sm:$0xff] %vm751_vm0, %v749_v14 }

</bundles_post_ra>
